<compile_context>
chip_gen: v7x
topology: tpu7x:2x2x1
jax: 0.10.0
libtpu: 0.0.40
codegen_flags: <defaults>
</compile_context>

<pallas_src>
import functools

import jax
import jax.numpy as jnp
from jax.experimental import pallas as pl
from jax.experimental.pallas import tpu as pltpu


def _soft_cr_kernel(feat_ref, w_ref, out_ref, *, tb, batch, need_mask):
    # feat_ref: (TB, N, Kp) block of batch elements (VMEM, native dtype)
    # w_ref:    (1, N)      [0, soft_label/(B*(N-1))...] weight row (VMEM, resident)
    # out_ref:  (1, 1, 128) this block's partial sum, broadcast across lanes
    f = feat_ref[...]                               # no full-tile f32 upcast
    q = f[:, 0:1, :]                                # anchor row per batch element
    # Row 0 of feat @ feat^T is the only row used downstream: VPU multiply +
    # XLU lane reduce, accumulated in f32 -> (TB, N) logits.
    logits = jnp.sum((f * q).astype(jnp.float32), axis=-1)
    m = jnp.max(logits, axis=-1, keepdims=True)
    lse = m + jnp.log(jnp.sum(jnp.exp(logits - m), axis=-1, keepdims=True))
    nls = lse - logits                              # == -log_softmax(logits)
    # w is 0 at column 0 and soft_label * 1/(B*(N-1)) at 1..N-1: this performs the
    # [:, 0, 1:] slice, the soft_label weighting and the mean normalization.
    weighted = nls * w_ref[...]                     # (TB, N)
    if need_mask:                                   # zero batch-padding rows
        row = (pl.program_id(0) * tb
               + jax.lax.broadcasted_iota(jnp.int32, (tb, 1), 0))
        weighted = jnp.where(row < batch, weighted, 0.0)
    partial = jnp.sum(weighted)                     # f32 scalar for this block
    out_ref[...] = jnp.full((1, 1, 128), partial, jnp.float32)


def soft_cr_loss(feat, soft_label, *, num, target_block_bytes=4 * 1024 * 1024):
    B, N = feat.shape[0], feat.shape[1]
    if N != num:  # static shape check (the torch module returns 0 in this case)
        return jnp.float32(0.0)
    assert soft_label.shape == (N - 1,), "soft_label must have length N-1"

    K = 1
    for d in feat.shape[2:]:
        K *= d
    feat2 = feat.reshape(B, N, K)

    # Lane-align K (zero padding contributes 0 to the row-0 dot products).
    Kp = ((K + 127) // 128) * 128
    if Kp != K:
        feat2 = jnp.pad(feat2, ((0, 0), (0, 0), (0, Kp - K)))

    # Batch block size: big enough to amortize per-step grid overhead and keep HBM
    # busy, small enough that a double-buffered block fits the VMEM budget on
    # v5e / v6e / v7x (target ~4 MiB per block; explicit 32 MiB scoped limit).
    per_elem_bytes = N * Kp * feat2.dtype.itemsize
    TB = int(max(1, min(B, target_block_bytes // per_elem_bytes)))
    G = pl.cdiv(B, TB)
    Bp = G * TB
    if Bp != B:  # pad batch to a whole number of blocks; padded rows masked in-kernel
        feat2 = jnp.pad(feat2, ((0, Bp - B), (0, 0), (0, 0)))

    # Fold [:, 0, 1:] selection + soft_label weighting + 1/(B*(N-1)) into one row.
    inv_count = 1.0 / float(B * (N - 1))
    w = jnp.concatenate(
        [jnp.zeros((1,), jnp.float32),
         soft_label.astype(jnp.float32) * jnp.float32(inv_count)]).reshape(1, N)

    partials = pl.pallas_call(
        functools.partial(_soft_cr_kernel, tb=TB, batch=B, need_mask=(Bp != B)),
        out_shape=jax.ShapeDtypeStruct((G, 1, 128), jnp.float32),
        grid=(G,),
        in_specs=[
            pl.BlockSpec((TB, N, Kp), lambda b: (b, 0, 0)),   # TB batch elems / step
            pl.BlockSpec((1, N), lambda b: (0, 0)),           # weight row, resident
        ],
        out_specs=pl.BlockSpec((1, 1, 128), lambda b: (b, 0, 0)),
        compiler_params=pltpu.CompilerParams(
            dimension_semantics=("parallel",),                # independent partials
            vmem_limit_bytes=32 * 1024 * 1024),
    )(feat2, w)
    return jnp.sum(partials[:, 0, 0])


def _reference(feat, soft_label, num):
    # Pure-JAX mirror of the PyTorch forward, for correctness checking.
    feat = feat.reshape(feat.shape[0], feat.shape[1], -1)
    _, N, _ = feat.shape
    if N != num:
        return jnp.float32(0.0)
    logits = jnp.matmul(feat, jnp.swapaxes(feat, 1, 2),
                        precision=jax.lax.Precision.HIGHEST)
    nls = -jax.nn.log_softmax(logits, axis=-1)[:, 0, 1:]
    return jnp.mean(nls * soft_label)


if __name__ == "__main__":
    key = jax.random.PRNGKey(0)
    k_f, k_s = jax.random.split(key)

    # feat (B, N, H, W) -> flattened K = H*W = 256 (lane-aligned); num = N = 8.
    B, N, H, W = 2, 8, 16, 16
    feat = jax.random.normal(k_f, (B, N, H, W), jnp.float32) * 0.125
    soft_label = jax.random.uniform(k_s, (N - 1,), jnp.float32)

    loss_fn = jax.jit(functools.partial(soft_cr_loss, num=N))
    loss = loss_fn(feat, soft_label)
    jax.block_until_ready(loss)

    ref = _reference(feat, soft_label, N)
    assert loss.shape == () and bool(jnp.isfinite(loss))
    assert bool(jnp.allclose(loss, ref, rtol=1e-5, atol=1e-5)), (loss, ref)
    print("KERNEL_OK")
</pallas_src>

<mosaic_0001>
module attributes {stable_mosaic.version = 11 : i64} {
  func.func @_soft_cr_kernel(%arg0: i32, %arg1: memref<2x8x256xf32, #tpu.memory_space<vmem>>, %arg2: memref<1x8xf32, #tpu.memory_space<vmem>>, %arg3: memref<1x1x128xf32, #tpu.memory_space<vmem>>) attributes {dimension_semantics = [#tpu.dimension_semantics<parallel>], iteration_bounds = array<i64: 1>, scalar_prefetch = 0 : i64, scratch_operands = 0 : i64, tpu.core_type = #tpu.core_type<tc>, window_params = [{transform_indices = @transform_0, window_bounds = array<i64: 2, 8, 256>}, {pipeline_mode = #tpu.pipeline_mode<synchronous>, transform_indices = @transform_1, window_bounds = array<i64: 1, 8>}, {transform_indices = @transform_2, window_bounds = array<i64: 1, 1, 128>}]} {
    %c0 = arith.constant 0 : index
    %c0_0 = arith.constant 0 : index
    %c0_1 = arith.constant 0 : index
    %0 = vector.load %arg1[%c0, %c0_0, %c0_1] : memref<2x8x256xf32, #tpu.memory_space<vmem>>, vector<2x8x256xf32>
    %1 = vector.extract_strided_slice %0 {offsets = [0, 0, 0], sizes = [2, 1, 256], strides = [1, 1, 1]} : vector<2x8x256xf32> to vector<2x1x256xf32>
    %2 = vector.broadcast %1 : vector<2x1x256xf32> to vector<2x8x256xf32>
    %3 = arith.mulf %0, %2 : vector<2x8x256xf32>
    %cst = arith.constant dense<0.000000e+00> : vector<2x8xf32>
    %4 = vector.multi_reduction <add>, %3, %cst [2] : vector<2x8x256xf32> to vector<2x8xf32>
    %cst_2 = arith.constant dense<0xFF800000> : vector<2xf32>
    %5 = vector.multi_reduction <maximumf>, %4, %cst_2 [1] : vector<2x8xf32> to vector<2xf32>
    %6 = vector.shape_cast %5 : vector<2xf32> to vector<2x1xf32>
    %7 = vector.broadcast %6 : vector<2x1xf32> to vector<2x8xf32>
    %8 = arith.subf %4, %7 : vector<2x8xf32>
    %9 = math.exp %8 : vector<2x8xf32>
    %cst_3 = arith.constant dense<0.000000e+00> : vector<2xf32>
    %10 = vector.multi_reduction <add>, %9, %cst_3 [1] : vector<2x8xf32> to vector<2xf32>
    %11 = vector.shape_cast %10 : vector<2xf32> to vector<2x1xf32>
    %12 = math.log %11 : vector<2x1xf32>
    %13 = arith.addf %6, %12 : vector<2x1xf32>
    %14 = vector.broadcast %13 : vector<2x1xf32> to vector<2x8xf32>
    %15 = arith.subf %14, %4 : vector<2x8xf32>
    %c0_4 = arith.constant 0 : index
    %c0_5 = arith.constant 0 : index
    %16 = vector.load %arg2[%c0_4, %c0_5] : memref<1x8xf32, #tpu.memory_space<vmem>>, vector<1x8xf32>
    %17 = vector.broadcast %16 : vector<1x8xf32> to vector<2x8xf32>
    %18 = arith.mulf %15, %17 : vector<2x8xf32>
    %19 = vector.shape_cast %18 : vector<2x8xf32> to vector<1x2x8xf32>
    %cst_6 = arith.constant dense<0.000000e+00> : vector<1xf32>
    %20 = vector.multi_reduction <add>, %19, %cst_6 [1, 2] : vector<1x2x8xf32> to vector<1xf32>
    %21 = vector.shape_cast %20 : vector<1xf32> to vector<1x1x1xf32>
    %22 = vector.extract %21[0, 0, 0] : f32 from vector<1x1x1xf32>
    %23 = vector.broadcast %22 : f32 to vector<1x1x128xf32>
    %c0_7 = arith.constant 0 : index
    %c0_8 = arith.constant 0 : index
    %c0_9 = arith.constant 0 : index
    %24 = vector.load %arg3[%c0_7, %c0_8, %c0_9] : memref<1x1x128xf32, #tpu.memory_space<vmem>>, vector<1x1x128xf32>
    tpu.vector_store %arg3[%c0_7, %c0_8, %c0_9], %23 {strides = array<i32>} : memref<1x1x128xf32, #tpu.memory_space<vmem>>, vector<1x1x128xf32>,
    return
  }
  func.func @transform_0(%arg0: i32) -> (i32, i32, i32) {
    %c0_i32 = arith.constant 0 : i32
    %c0_i32_0 = arith.constant 0 : i32
    %c0_i32_1 = arith.constant 0 : i32
    return %arg0, %c0_i32, %c0_i32_0 : i32, i32, i32
  }
  func.func @transform_1(%arg0: i32) -> (i32, i32) {
    %c0_i32 = arith.constant 0 : i32
    %c0_i32_0 = arith.constant 0 : i32
    %c0_i32_1 = arith.constant 0 : i32
    return %c0_i32, %c0_i32_0 : i32, i32
  }
  func.func @transform_2(%arg0: i32) -> (i32, i32, i32) {
    %c0_i32 = arith.constant 0 : i32
    %c0_i32_0 = arith.constant 0 : i32
    %c0_i32_1 = arith.constant 0 : i32
    return %arg0, %c0_i32, %c0_i32_0 : i32, i32, i32
  }
}

</mosaic_0001>

<bundles_post_ra>
// kernel: soft_cr_loss.1
= control target key start
LH: loop header
LB: loop body
LE: loop exit
PB: predicated region body
PF: predicated region fallthrough
CT: control target
= control target key end

     0   :  { %v16_v0 = vlaneseq  ;;  %s223_s0 = inlined_call_operand.vmem [shape: f32[2,8,256], index: 0, kind: input, shape index: {}]   ;;  %s224_s1 = inlined_call_operand.vmem [shape: f32[1,8], index: 1, kind: input, shape index: {}]   ;;  %s225_s2 = inlined_call_operand.hbm [shape: f32[1,1,128], index: 2, kind: output, shape index: {}]  }
   0x1   :  { %7 = vsyncpa [#allocation3], 0  ;;  %v12_v1 = vld [vmem:[%s223_s0] sm:$0xff]  ;;  %v13_v4 = vld [vmem:[%s223_s0 + $0x8] sm:$0xff]  ;;  %vm54_vm0 = vcmask 1041409   ;;  %vm57_vm1 = vcmask 58368  }
   0x2   :  { %v17_v2 = vshrl.u32 %v16_v0, 7  ;;  %v45_v3 = vand.u32 127, %v16_v0  ;;  %v14_v5 = vld [vmem:[%s223_s0 + $0x10] sm:$0xff]  ;;  %v15_v6 = vld [vmem:[%s223_s0 + $0x18] sm:$0xff]  ;;  %v174_v25 = vmov 0   ;;  %s175_s18 = smov [#allocation2]  }
   0x3   :  { %143 = vset.pattern.permute.xlu0 %v174_v25  ;;  %142 = vset.pattern.permute.xlu1 %v174_v25  ;;  %v137_v46 = vld [vmem:[%s224_s1] ss:$0 sm:$0xff]  ;;  %s129_s19 = sshll.u32 %s175_s18, 4  ;;  %s130_s19 = int_to_ptr.vmem [resolvable:$true] %s129_s19 }
   0x4   :  { %v18_v7 = vsub.s32 0, %v17_v2  ;;  %v48_v8 = vsub.s32 %v45_v3, %v17_v2  ;;  %v68_v26 = vsub.s32 1, %v17_v2  ;;  %s150_s1 = scalar_lea.vmem %s130_s19, 16  ;;  %s154_s21 = scalar_lea.vmem %s130_s19, 32 }
   0x5   :  { %p151_p0 = scmp.ne.s32.totalorder %s130_s19, %s150_s1  ;;  %p155_p1 = scmp.lt.s32.totalorder %s130_s19, %s130_s19 }
   0x6   :  { %v19_v9 = vrot.slane %v12_v1, %v18_v7  ;;  %v23_v10 = vrot.slane %v13_v4, %v18_v7  ;;  %v27_v11 = vrot.slane %v14_v5, %v18_v7  ;;  %v31_v12 = vrot.slane %v15_v6, %v18_v7  ;;  %p156_p2 = scmp.lt.s32.totalorder %s154_s21, %s150_s1 }
   0x8   :  { %v32_v13 = vmul.f32 %v19_v9, %v12_v1  ;;  %v33_v14 = vmul.f32 %v23_v10, %v13_v4  ;;  %v34_v15 = vmul.f32 %v27_v11, %v14_v5  ;;  %v35_v16 = vmul.f32 %v31_v12, %v15_v6  ;;  %p157_p3 = por %p156_p2, %p155_p1 }
   0xa   :  { %v36_v17 = vadd.f32 %v33_v14, %v32_v13  ;;  %v39_v18 = vadd.f32 %v35_v16, %v34_v15  ;;  %p158_p4 = pnand %p157_p3, %p151_p0 }
   0xc   :  { %37 = vadd.xlane.f32.xlu0 %v36_v17 }
  0x10   :  { %40 = vadd.xlane.f32.xlu0 %v39_v18 }
  0x99   :  { %v38_v19 = vpop.xlane.xlu0 %37 }
  0x9a   :  { %v49_v21 = vrot.slane %v38_v19, %v48_v8 }
  0x9d   :  { %v41_v20 = vpop.xlane.xlu0 %40 }
  0x9e   :  { %v53_v22 = vrot.slane %v41_v20, %v48_v8 }
  0xa0   :  { %v55_v23 = vsel %vm54_vm0, %v53_v22, %v49_v21 }
  0xa1   :  { %v58_v24 = vsel %vm57_vm1, %v55_v23, -inf }
  0xa2   :  { %59 = vmax.xlane.f32.xlu1 %v58_v24 }
 0x12f   :  { %v60_v27 = vpop.xlane.xlu1 %59 }
 0x130   :  { %v65_v28 = vrot.slane %v60_v27, %v18_v7  ;;  %v69_v29 = vrot.slane %v60_v27, %v68_v26 }
 0x132   :  { %v72_v30 = vsub.f32 %v38_v19, %v65_v28  ;;  %v73_v31 = vsub.f32 %v41_v20, %v69_v29 }
 0x134   :  { %v74_v32 = vmul.f32 1.442695, %v72_v30  ;;  %v76_v33 = vmul.f32 1.442695, %v73_v31 }
 0x136   :  { %144 = vpow2.f32 %v74_v32 }
 0x137   :  { %146 = vpow2.f32 %v76_v33 }
 0x140   :  { %v145_v34 = vpop.eup %144 }
 0x141   :  { %v147_v35 = vpop.eup %146  ;;  %81 = vperm.xlu1 %142, %v145_v34  }
 0x142   :  { %84 = vperm.xlu0 %143, %v147_v35  }
 0x1c0   :  { %v82_v36 = vpop.permute.xlu1 %81 }
 0x1c1   :  { %v85_v37 = vpop.permute.xlu0 %84  ;;  %v89_v38 = vrot.slane %v82_v36, %v48_v8 }
 0x1c2   :  { %v93_v39 = vrot.slane %v85_v37, %v48_v8 }
 0x1c4   :  { %v94_v40 = vsel %vm54_vm0, %v93_v39, %v89_v38 }
 0x1c5   :  { %v96_v41 = vsel %vm57_vm1, %v94_v40, 0.0 }
 0x1c6   :  { %97 = vadd.xlane.f32.xlu1 %v96_v41 }
 0x253   :  { %v98_v42 = vpop.xlane.xlu1 %97 }
 0x254   :  { %148 = vlog2.f32 %v98_v42 }
 0x25e   :  { %v149_v43 = vpop.eup %148 }
 0x25f   :  { %v100_v44 = vmul.f32 0.6931472, %v149_v43 }
 0x261   :  { %v101_v45 = vadd.f32 %v100_v44, %v60_v27 }
 0x263   :  { %v102_v47 = vsub.f32 %v101_v45, %v55_v23 }
 0x265   :  { %v110_v48 = vmul.f32 %v137_v46, %v102_v47 }
 0x267   :  { %v111_v49 = vsel %vm57_vm1, %v110_v48, 0.0 }
 0x268   :  { %112 = vadd.xlane.f32.xlu0 %v111_v49 }
 0x2f5   :  { %v113_v50 = vpop.xlane.xlu0 %112 }
 0x2f6   :  { %v114_v51 = vrot.slane %v113_v50, 4 }
 0x2f8   :  { %v115_v52 = vadd.f32 %v114_v51, %v113_v50 }
 0x2fa   :  { %v116_v53 = vrot.slane %v115_v52, 2 }
 0x2fc   :  { %v117_v54 = vadd.f32 %v116_v53, %v115_v52 }
 0x2fe   :  { %v118_v55 = vrot.slane %v117_v54, 1 }
 0x300   :  { %v119_v56 = vadd.f32 %v118_v55, %v117_v54 }
 0x302   :  { %138 = vpush %v119_v56 }
 0x333   :  { %s139_s20 = spop %138 }
 0x334   :  { %v121_v57 = vstv %s139_s20 }
 0x335   :  { %122 = vst [vmem:[#allocation2] sm:$0x1] %v121_v57 }
 0x336   :  { %161 = shalt.err (!%p158_p4)
}
 0x337   :  { %s162_s24 = scalar_lea.hbm %s225_s2, 16 }
 0x338   :  { %p163_p5 = scmp.ne.s32.totalorder %s225_s2, %s162_s24  ;;  %p166_p6 = scmp.lt.u32.totalorder %s162_s24, %s225_s2 }
 0x33a   :  { %p168_p7 = pnand %p166_p6, %p163_p5 }
 0x33c   :  { %171 = shalt.err (!%p168_p7)
}
 0x33d   :  { %132 = dma.vmem_to_hbm [thread:$0]  %s130_s19, 16, %s225_s2, [#allocation3]  }
 0x33e   :  { %172 = dma.done.wait [#allocation3], 16  }
 0x33f   :  { %173 = vsyncadd [#allocation3], 4294967280 }
 0x340   :  { %136 = vsyncpa [#allocation3], 1 }

</bundles_post_ra>
